<compile_context>
chip_gen: v7x
topology: tpu7x:2x2x1
jax: 0.10.0
libtpu: 0.0.40
codegen_flags: <defaults>
</compile_context>

<pallas_src>
import math

import jax
import jax.numpy as jnp
from jax import lax
from jax.experimental import pallas as pl
from jax.experimental.pallas import tpu as pltpu

_INV_SQRT2 = 1.0 / math.sqrt(2.0)
_LN_EPS = 1e-5  # nn.LayerNorm default


def _simple_res_block_kernel(x_ref, g_ref, bta_ref, w1_ref, b1_ref, w2_ref, b2_ref, o_ref):
    """One row tile: o = x + Linear2(GELU(Linear1(LayerNorm(x))))."""
    x = x_ref[...].astype(jnp.float32)                       # (TM, C)

    # --- LayerNorm (f32) ---
    mean = jnp.mean(x, axis=-1, keepdims=True)
    xc = x - mean
    var = jnp.mean(xc * xc, axis=-1, keepdims=True)
    xn = xc * lax.rsqrt(var + _LN_EPS)
    xn = xn * g_ref[...] + bta_ref[...]

    # --- Linear1 + exact GELU (bf16 operands on the MXU, f32 accumulation/epilogue) ---
    h = jnp.dot(xn.astype(w1_ref.dtype), w1_ref[...],
                preferred_element_type=jnp.float32) + b1_ref[...]
    h = 0.5 * h * (1.0 + lax.erf(h * _INV_SQRT2))            # matches nn.GELU() default

    # --- Linear2 ---
    y = jnp.dot(h.astype(w2_ref.dtype), w2_ref[...],
                preferred_element_type=jnp.float32) + b2_ref[...]

    # --- residual add in f32, then cast to output dtype ---
    o_ref[...] = (x + y).astype(o_ref.dtype)


def _round_up(v, m):
    return (v + m - 1) // m * m


def simple_res_block_forward(x, params, *, tile_m=256):
    """x: (..., C) -> (..., C), same semantics as SimpleResBlock.forward."""
    *lead, C = x.shape
    x2d = x.reshape(-1, C)
    M = x2d.shape[0]

    # Parameters: big weight matrices in bf16 for the MXU, everything else f32.
    # Weights stored as (in, out) so the kernel does x @ W (== PyTorch x @ W.T).
    w1 = params["w1"].astype(jnp.bfloat16)                   # (C, C)
    w2 = params["w2"].astype(jnp.bfloat16)                   # (C, C)
    b1 = params["b1"].reshape(1, C).astype(jnp.float32)
    b2 = params["b2"].reshape(1, C).astype(jnp.float32)
    gamma = params["gamma"].reshape(1, C).astype(jnp.float32)
    beta = params["beta"].reshape(1, C).astype(jnp.float32)

    # Row-tile size: as large as possible (multiple of the 8-row f32 sublane tile),
    # capped so the f32 intermediates (tile_m x C) stay around 4 MiB.
    itm_cap = max(8, ((4 << 20) // (4 * C)) // 8 * 8)
    tm = min(max(tile_m, 8), itm_cap)
    tm = max(8, (tm // 8) * 8)
    tm = min(tm, _round_up(M, 8))

    grid_m = pl.cdiv(M, tm)
    m_pad = grid_m * tm
    if m_pad != M:
        # Zero rows are safe through LayerNorm (var=0 -> rsqrt(eps) finite) and are
        # sliced off below.
        x2d = jnp.pad(x2d, ((0, m_pad - M), (0, 0)))

    # Advisory cost estimate for XLA scheduling around the custom call.
    cost = pl.CostEstimate(
        flops=4 * M * C * C,                                  # two (C x C) matmuls per row
        transcendentals=2 * M * C,                            # erf (+ rsqrt)
        bytes_accessed=2 * M * C * 4 + (w1.size + w2.size) * 2 + 4 * C * 4,
    )

    # VMEM budget: resident weights + double-buffered x/out row tiles + headroom.
    weight_bytes = (w1.size + w2.size) * 2                    # bf16
    io_bytes = 2 * 2 * tm * C * 4                             # x + out tiles, double-buffered
    vmem_limit = int(min(max(2 * weight_bytes + io_bytes + (16 << 20), 32 << 20), 100 << 20))

    out_shape = jax.ShapeDtypeStruct((m_pad, C), x.dtype)

    def build_call(single_buffer_weights):
        if single_buffer_weights:
            # Grid-invariant weights don't need double-buffering; single-buffering
            # halves their VMEM footprint (important for v7x's 64 MiB VMEM at large C).
            def w_spec(shp):
                return pl.BlockSpec(shp, lambda i: (0, 0), pipeline_mode=pl.Buffered(1))
        else:
            def w_spec(shp):
                return pl.BlockSpec(shp, lambda i: (0, 0))

        grid_spec = pltpu.PrefetchScalarGridSpec(
            num_scalar_prefetch=0,
            grid=(grid_m,),
            in_specs=[
                pl.BlockSpec((tm, C), lambda i: (i, 0)),      # x row tile
                pl.BlockSpec((1, C), lambda i: (0, 0)),       # gamma
                pl.BlockSpec((1, C), lambda i: (0, 0)),       # beta
                w_spec((C, C)),                               # w1 (resident)
                pl.BlockSpec((1, C), lambda i: (0, 0)),       # b1
                w_spec((C, C)),                               # w2 (resident)
                pl.BlockSpec((1, C), lambda i: (0, 0)),       # b2
            ],
            out_specs=pl.BlockSpec((tm, C), lambda i: (i, 0)),
        )
        return pl.pallas_call(
            _simple_res_block_kernel,
            out_shape=out_shape,
            grid_spec=grid_spec,
            compiler_params=pltpu.CompilerParams(
                dimension_semantics=("parallel",),            # megacore sharding on v7x
                vmem_limit_bytes=vmem_limit,
            ),
            cost_estimate=cost,
        )

    args = (x2d, gamma, beta, w1, b1, w2, b2)
    # Only bother with single-buffered weights when they are big enough to matter.
    if weight_bytes > (24 << 20):
        try:
            out2d = build_call(True)(*args)
        except Exception:
            # pipeline_mode=pl.Buffered(1) unsupported in this build -> default buffering.
            out2d = build_call(False)(*args)
    else:
        out2d = build_call(False)(*args)

    return out2d[:M].reshape(*lead, C)


def init_params(key, channels):
    """nn.Linear-style init; LayerNorm affine perturbed slightly so it is exercised."""
    k1, k2, k3, k4, k5, k6 = jax.random.split(key, 6)
    bound = 1.0 / math.sqrt(channels)
    w1 = jax.random.uniform(k1, (channels, channels), jnp.float32, -bound, bound)
    b1 = jax.random.uniform(k2, (channels,), jnp.float32, -bound, bound)
    w2 = jax.random.uniform(k3, (channels, channels), jnp.float32, -bound, bound)
    b2 = jax.random.uniform(k4, (channels,), jnp.float32, -bound, bound)
    gamma = 1.0 + 0.05 * jax.random.normal(k5, (channels,), jnp.float32)
    beta = 0.05 * jax.random.normal(k6, (channels,), jnp.float32)
    return {"w1": w1, "b1": b1, "w2": w2, "b2": b2, "gamma": gamma, "beta": beta}


def _reference_f32(x, params):
    """Pure-JAX f32 reference matching the PyTorch module exactly."""
    mean = jnp.mean(x, axis=-1, keepdims=True)
    xc = x - mean
    var = jnp.mean(xc * xc, axis=-1, keepdims=True)
    xn = xc / jnp.sqrt(var + _LN_EPS) * params["gamma"] + params["beta"]
    h = xn @ params["w1"] + params["b1"]
    h = 0.5 * h * (1.0 + lax.erf(h * _INV_SQRT2))
    return x + (h @ params["w2"] + params["b2"])


def _reference_matched(x, params):
    """Reference that mirrors the kernel's bf16-matmul / f32-epilogue precision."""
    xf = x.astype(jnp.float32)
    mean = jnp.mean(xf, axis=-1, keepdims=True)
    xc = xf - mean
    var = jnp.mean(xc * xc, axis=-1, keepdims=True)
    xn = xc * lax.rsqrt(var + _LN_EPS) * params["gamma"] + params["beta"]
    w1 = params["w1"].astype(jnp.bfloat16)
    w2 = params["w2"].astype(jnp.bfloat16)
    h = jnp.dot(xn.astype(jnp.bfloat16), w1, preferred_element_type=jnp.float32) + params["b1"]
    h = 0.5 * h * (1.0 + lax.erf(h * _INV_SQRT2))
    y = jnp.dot(h.astype(jnp.bfloat16), w2, preferred_element_type=jnp.float32) + params["b2"]
    return xf + y


if __name__ == "__main__":
    # Small shapes consistent with the module: (batch, seq, channels); channels is a
    # multiple of 128 so tiles are lane-dense / representative.
    batch, tokens, channels = 2, 8, 128

    key = jax.random.PRNGKey(0)
    kx, kp = jax.random.split(key)
    x = jax.random.normal(kx, (batch, tokens, channels), jnp.float32)
    params = init_params(kp, channels)

    y = simple_res_block_forward(x, params)
    y = jax.block_until_ready(y)
    assert y.shape == (batch, tokens, channels)

    # Tight check against a reference with the same bf16-matmul precision (kernel logic).
    y_matched = _reference_matched(x, params)
    assert jnp.allclose(y, y_matched, atol=1e-3, rtol=1e-3), float(jnp.max(jnp.abs(y - y_matched)))

    # Semantic check against the exact f32 PyTorch-equivalent reference
    # (tolerance accounts for bf16 matmul operands).
    y_f32 = _reference_f32(x, params)
    assert jnp.allclose(y, y_f32, atol=5e-2, rtol=5e-2), float(jnp.max(jnp.abs(y - y_f32)))

    print("KERNEL_OK")
</pallas_src>

<mosaic_0001>
module attributes {stable_mosaic.version = 11 : i64} {
  func.func @_simple_res_block_kernel(%arg0: i32, %arg1: memref<16x128xf32, #tpu.memory_space<vmem>>, %arg2: memref<1x128xf32, #tpu.memory_space<vmem>>, %arg3: memref<1x128xf32, #tpu.memory_space<vmem>>, %arg4: memref<128x128xbf16, #tpu.memory_space<vmem>>, %arg5: memref<1x128xf32, #tpu.memory_space<vmem>>, %arg6: memref<128x128xbf16, #tpu.memory_space<vmem>>, %arg7: memref<1x128xf32, #tpu.memory_space<vmem>>, %arg8: memref<16x128xf32, #tpu.memory_space<vmem>>) attributes {dimension_semantics = [#tpu.dimension_semantics<parallel>], iteration_bounds = array<i64: 1>, scalar_prefetch = 0 : i64, scratch_operands = 0 : i64, tpu.core_type = #tpu.core_type<tc>, window_params = [{transform_indices = @transform_0, window_bounds = array<i64: 16, 128>}, {pipeline_mode = #tpu.pipeline_mode<synchronous>, transform_indices = @transform_1, window_bounds = array<i64: 1, 128>}, {pipeline_mode = #tpu.pipeline_mode<synchronous>, transform_indices = @transform_2, window_bounds = array<i64: 1, 128>}, {pipeline_mode = #tpu.pipeline_mode<synchronous>, transform_indices = @transform_3, window_bounds = array<i64: 128, 128>}, {pipeline_mode = #tpu.pipeline_mode<synchronous>, transform_indices = @transform_4, window_bounds = array<i64: 1, 128>}, {pipeline_mode = #tpu.pipeline_mode<synchronous>, transform_indices = @transform_5, window_bounds = array<i64: 128, 128>}, {pipeline_mode = #tpu.pipeline_mode<synchronous>, transform_indices = @transform_6, window_bounds = array<i64: 1, 128>}, {transform_indices = @transform_7, window_bounds = array<i64: 16, 128>}]} {
    %c0 = arith.constant 0 : index
    %c0_0 = arith.constant 0 : index
    %0 = vector.load %arg1[%c0, %c0_0] : memref<16x128xf32, #tpu.memory_space<vmem>>, vector<16x128xf32>
    %cst = arith.constant dense<0.000000e+00> : vector<16xf32>
    %1 = vector.multi_reduction <add>, %0, %cst [1] : vector<16x128xf32> to vector<16xf32>
    %2 = vector.shape_cast %1 : vector<16xf32> to vector<16x1xf32>
    %cst_1 = arith.constant 1.280000e+02 : f32
    %3 = vector.broadcast %cst_1 : f32 to vector<16x1xf32>
    %4 = arith.divf %2, %3 : vector<16x1xf32>
    %5 = vector.broadcast %4 : vector<16x1xf32> to vector<16x128xf32>
    %6 = arith.subf %0, %5 : vector<16x128xf32>
    %7 = arith.mulf %6, %6 : vector<16x128xf32>
    %cst_2 = arith.constant dense<0.000000e+00> : vector<16xf32>
    %8 = vector.multi_reduction <add>, %7, %cst_2 [1] : vector<16x128xf32> to vector<16xf32>
    %9 = vector.shape_cast %8 : vector<16xf32> to vector<16x1xf32>
    %cst_3 = arith.constant 1.280000e+02 : f32
    %10 = vector.broadcast %cst_3 : f32 to vector<16x1xf32>
    %11 = arith.divf %9, %10 : vector<16x1xf32>
    %cst_4 = arith.constant 9.99999974E-6 : f32
    %12 = vector.broadcast %cst_4 : f32 to vector<16x1xf32>
    %13 = arith.addf %11, %12 : vector<16x1xf32>
    %14 = math.rsqrt %13 : vector<16x1xf32>
    %15 = vector.broadcast %14 : vector<16x1xf32> to vector<16x128xf32>
    %16 = arith.mulf %6, %15 : vector<16x128xf32>
    %c0_5 = arith.constant 0 : index
    %c0_6 = arith.constant 0 : index
    %17 = vector.load %arg2[%c0_5, %c0_6] : memref<1x128xf32, #tpu.memory_space<vmem>>, vector<1x128xf32>
    %18 = vector.broadcast %17 : vector<1x128xf32> to vector<16x128xf32>
    %19 = arith.mulf %16, %18 : vector<16x128xf32>
    %c0_7 = arith.constant 0 : index
    %c0_8 = arith.constant 0 : index
    %20 = vector.load %arg3[%c0_7, %c0_8] : memref<1x128xf32, #tpu.memory_space<vmem>>, vector<1x128xf32>
    %21 = vector.broadcast %20 : vector<1x128xf32> to vector<16x128xf32>
    %22 = arith.addf %19, %21 : vector<16x128xf32>
    %23 = arith.truncf %22 : vector<16x128xf32> to vector<16x128xbf16>
    %c0_9 = arith.constant 0 : index
    %c0_10 = arith.constant 0 : index
    %24 = vector.load %arg4[%c0_9, %c0_10] : memref<128x128xbf16, #tpu.memory_space<vmem>>, vector<128x128xbf16>
    %cst_11 = arith.constant dense<0.000000e+00> : vector<16x128xf32>
    %25 = tpu.matmul %23, %24, %cst_11 {dimension_numbers = #tpu.dot_dimension_numbers<[1], [0], [0], [1], [0, 0, 1, 1], [], []>} : vector<16x128xbf16>, vector<128x128xbf16>, vector<16x128xf32> -> vector<16x128xf32>
    %c0_12 = arith.constant 0 : index
    %c0_13 = arith.constant 0 : index
    %26 = vector.load %arg5[%c0_12, %c0_13] : memref<1x128xf32, #tpu.memory_space<vmem>>, vector<1x128xf32>
    %27 = vector.broadcast %26 : vector<1x128xf32> to vector<16x128xf32>
    %28 = arith.addf %25, %27 : vector<16x128xf32>
    %cst_14 = arith.constant 5.000000e-01 : f32
    %29 = vector.broadcast %cst_14 : f32 to vector<16x128xf32>
    %30 = arith.mulf %29, %28 : vector<16x128xf32>
    %cst_15 = arith.constant 0.707106769 : f32
    %31 = vector.broadcast %cst_15 : f32 to vector<16x128xf32>
    %32 = arith.mulf %28, %31 : vector<16x128xf32>
    %33 = math.erf %32 : vector<16x128xf32>
    %cst_16 = arith.constant 1.000000e+00 : f32
    %34 = vector.broadcast %cst_16 : f32 to vector<16x128xf32>
    %35 = arith.addf %34, %33 : vector<16x128xf32>
    %36 = arith.mulf %30, %35 : vector<16x128xf32>
    %37 = arith.truncf %36 : vector<16x128xf32> to vector<16x128xbf16>
    %c0_17 = arith.constant 0 : index
    %c0_18 = arith.constant 0 : index
    %38 = vector.load %arg6[%c0_17, %c0_18] : memref<128x128xbf16, #tpu.memory_space<vmem>>, vector<128x128xbf16>
    %cst_19 = arith.constant dense<0.000000e+00> : vector<16x128xf32>
    %39 = tpu.matmul %37, %38, %cst_19 {dimension_numbers = #tpu.dot_dimension_numbers<[1], [0], [0], [1], [0, 0, 1, 1], [], []>} : vector<16x128xbf16>, vector<128x128xbf16>, vector<16x128xf32> -> vector<16x128xf32>
    %c0_20 = arith.constant 0 : index
    %c0_21 = arith.constant 0 : index
    %40 = vector.load %arg7[%c0_20, %c0_21] : memref<1x128xf32, #tpu.memory_space<vmem>>, vector<1x128xf32>
    %41 = vector.broadcast %40 : vector<1x128xf32> to vector<16x128xf32>
    %42 = arith.addf %39, %41 : vector<16x128xf32>
    %43 = arith.addf %0, %42 : vector<16x128xf32>
    %c0_22 = arith.constant 0 : index
    %c0_23 = arith.constant 0 : index
    %44 = vector.load %arg8[%c0_22, %c0_23] : memref<16x128xf32, #tpu.memory_space<vmem>>, vector<16x128xf32>
    tpu.vector_store %arg8[%c0_22, %c0_23], %43 {strides = array<i32>} : memref<16x128xf32, #tpu.memory_space<vmem>>, vector<16x128xf32>,
    return
  }
  func.func @transform_0(%arg0: i32) -> (i32, i32) {
    %c0_i32 = arith.constant 0 : i32
    %c0_i32_0 = arith.constant 0 : i32
    return %arg0, %c0_i32 : i32, i32
  }
  func.func @transform_1(%arg0: i32) -> (i32, i32) {
    %c0_i32 = arith.constant 0 : i32
    %c0_i32_0 = arith.constant 0 : i32
    %c0_i32_1 = arith.constant 0 : i32
    return %c0_i32, %c0_i32_0 : i32, i32
  }
  func.func @transform_2(%arg0: i32) -> (i32, i32) {
    %c0_i32 = arith.constant 0 : i32
    %c0_i32_0 = arith.constant 0 : i32
    %c0_i32_1 = arith.constant 0 : i32
    return %c0_i32, %c0_i32_0 : i32, i32
  }
  func.func @transform_3(%arg0: i32) -> (i32, i32) {
    %c0_i32 = arith.constant 0 : i32
    %c0_i32_0 = arith.constant 0 : i32
    %c0_i32_1 = arith.constant 0 : i32
    return %c0_i32, %c0_i32_0 : i32, i32
  }
  func.func @transform_4(%arg0: i32) -> (i32, i32) {
    %c0_i32 = arith.constant 0 : i32
    %c0_i32_0 = arith.constant 0 : i32
    %c0_i32_1 = arith.constant 0 : i32
    return %c0_i32, %c0_i32_0 : i32, i32
  }
  func.func @transform_5(%arg0: i32) -> (i32, i32) {
    %c0_i32 = arith.constant 0 : i32
    %c0_i32_0 = arith.constant 0 : i32
    %c0_i32_1 = arith.constant 0 : i32
    return %c0_i32, %c0_i32_0 : i32, i32
  }
  func.func @transform_6(%arg0: i32) -> (i32, i32) {
    %c0_i32 = arith.constant 0 : i32
    %c0_i32_0 = arith.constant 0 : i32
    %c0_i32_1 = arith.constant 0 : i32
    return %c0_i32, %c0_i32_0 : i32, i32
  }
  func.func @transform_7(%arg0: i32) -> (i32, i32) {
    %c0_i32 = arith.constant 0 : i32
    %c0_i32_0 = arith.constant 0 : i32
    return %arg0, %c0_i32 : i32, i32
  }
}

</mosaic_0001>

<bundles_post_ra>
// kernel: tpu_custom_call.1
= control target key start
LH: loop header
LB: loop body
LE: loop exit
PB: predicated region body
PF: predicated region fallthrough
CT: control target
= control target key end

     0   :  { %12 = vsyncpa [#allocation3], 0  ;;  %s726_s0 = inlined_call_operand.hbm [shape: f32[16,128], index: 0, kind: input, shape index: {}]   ;;  %s727_s1 = inlined_call_operand.vmem [shape: f32[1,128], index: 1, kind: input, shape index: {}]   ;;  %s728_s2 = inlined_call_operand.vmem [shape: f32[1,128], index: 2, kind: input, shape index: {}]   ;;  %s729_s3 = inlined_call_operand.hbm [shape: bf16[128,128], index: 3, kind: input, shape index: {}]   ;;  %s730_s4 = inlined_call_operand.vmem [shape: f32[1,128], index: 4, kind: input, shape index: {}]   ;;  %s731_s5 = inlined_call_operand.hbm [shape: bf16[128,128], index: 5, kind: input, shape index: {}]   ;;  %s732_s6 = inlined_call_operand.vmem [shape: f32[1,128], index: 6, kind: input, shape index: {}]   ;;  %s733_s7 = inlined_call_operand.hbm [shape: f32[16,128], index: 7, kind: output, shape index: {}]  }
   0x1   :  { %13 = vsyncpa [#allocation6], 0 }
   0x2   :  { %14 = vsyncpa [#allocation4], 0  ;;  %s576_s24 = smov [#allocation5]   ;;  %s482_s28 = scalar_lea.hbm %s729_s3, 1024 }
   0x3   :  { %s36_s25 = sshll.u32 %s576_s24, 4  ;;  %p483_p0 = scmp.ne.s32.totalorder %s729_s3, %s482_s28  ;;  %s37_s25 = int_to_ptr.vmem [resolvable:$true] %s36_s25 }
   0x4   :  { %p486_p1 = scmp.lt.u32.totalorder %s482_s28, %s729_s3 }
   0x6   :  { %p488_p2 = pnand %p486_p1, %p483_p0 }
   0x8   :  { %491 = shalt.err (!%p488_p2)
}
   0x9   :  { %s492_s10 = scalar_lea.vmem %s37_s25, 1024  ;;  %p497_p4 = scmp.lt.s32.totalorder %s37_s25, %s37_s25 }
   0xa   :  { %p493_p3 = scmp.ne.s32.totalorder %s37_s25, %s492_s10  ;;  %p498_p5 = scmp.lt.s32.totalorder %s492_s10, %s492_s10 }
   0xc   :  { %p499_p6 = por %p498_p5, %p497_p4 }
   0xe   :  { %p500_p7 = pnand %p499_p6, %p493_p3 }
  0x10   :  { %503 = shalt.err (!%p500_p7)
}
  0x11   :  { %s577_s11 = smov 64   ;;  %s578_s12 = smov 4  }
  0x12   :  { %42 = dma.hbm_to_vmem [thread:$0]  %s729_s3, 1024, %s37_s25, [#allocation6], %s577_s11, %s577_s11, %s578_s12  }
  0x13   :  { %s579_s15 = smov [#allocation2]   ;;  %s504_s19 = scalar_lea.hbm %s726_s0, 256 }
  0x14   :  { %s20_s16 = sshll.u32 %s579_s15, 4  ;;  %p505_p8 = scmp.ne.s32.totalorder %s726_s0, %s504_s19  ;;  %s21_s16 = int_to_ptr.vmem [resolvable:$true] %s20_s16 }
  0x15   :  { %p508_p9 = scmp.lt.u32.totalorder %s504_s19, %s726_s0 }
  0x17   :  { %p510_p10 = pnand %p508_p9, %p505_p8 }
  0x19   :  { %513 = shalt.err (!%p510_p10)
}
  0x1a   :  { %s514_s24 = scalar_lea.vmem %s21_s16, 256  ;;  %p519_p12 = scmp.lt.s32.totalorder %s21_s16, %s21_s16 }
  0x1b   :  { %p515_p11 = scmp.ne.s32.totalorder %s21_s16, %s514_s24  ;;  %p520_p13 = scmp.lt.s32.totalorder %s514_s24, %s514_s24 }
  0x1d   :  { %p521_p0 = por %p520_p13, %p519_p12 }
  0x1f   :  { %p522_p1 = pnand %p521_p0, %p515_p11 }
  0x21   :  { %525 = shalt.err (!%p522_p1)
}
  0x22   :  { %s580_s3 = smov 128   ;;  %s581_s25 = smov 8  }
  0x23   :  { %26 = dma.hbm_to_vmem [thread:$0]  %s726_s0, 256, %s21_s16, [#allocation3], %s580_s3, %s580_s3, %s581_s25  }
  0x24   :  { %s582_s28 = smov [#allocation7]   ;;  %s526_s9 = scalar_lea.hbm %s731_s5, 1024 }
  0x25   :  { %s50_s29 = sshll.u32 %s582_s28, 4  ;;  %p527_p2 = scmp.ne.s32.totalorder %s731_s5, %s526_s9  ;;  %s51_s29 = int_to_ptr.vmem [resolvable:$true] %s50_s29 }
  0x26   :  { %p530_p3 = scmp.lt.u32.totalorder %s526_s9, %s731_s5 }
  0x28   :  { %p532_p4 = pnand %p530_p3, %p527_p2 }
  0x2a   :  { %535 = shalt.err (!%p532_p4)
}
  0x2b   :  { %s536_s17 = scalar_lea.vmem %s51_s29, 1024  ;;  %p541_p6 = scmp.lt.s32.totalorder %s51_s29, %s51_s29 }
  0x2c   :  { %p537_p5 = scmp.ne.s32.totalorder %s51_s29, %s536_s17  ;;  %p542_p7 = scmp.lt.s32.totalorder %s536_s17, %s536_s17 }
  0x2e   :  { %p543_p8 = por %p542_p7, %p541_p6 }
  0x30   :  { %p544_p9 = pnand %p543_p8, %p537_p5 }
  0x32   :  { %547 = shalt.err (!%p544_p9)
}
  0x33   :  { %56 = dma.hbm_to_vmem [thread:$0]  %s731_s5, 1024, %s51_s29, [#allocation6], %s577_s11, %s577_s11, %s578_s12  }
  0x34   :  { %570 = dma.done.wait [#allocation3], 256  }
  0x35   :  { %571 = vsyncadd [#allocation3], 4294967040 }
  0x36   :  { %572 = dma.done.wait [#allocation6], 2048  }
  0x37   :  { %573 = vsyncadd [#allocation6], 4294965248  ;;  %v671_v0 = vld [vmem:[#allocation2] sm:$0xff]  ;;  %v673_v1 = vld [vmem:[#allocation2 + $0x8] sm:$0xff]  ;;  %v583_v3 = vmov 0.0   ;;  %vm584_vm0 = vmmov 0  }
  0x38   :  { %71 = vadd.xlane.f32.xlu0 %v671_v0  ;;  %v458_v2 = vld [vmem:[#allocation5] sm:$0xff]   ;;  %408 = vmatprep.subr.bf16.mxu0 %v583_v3  ;;  %v459_v12 = vld [vmem:[#allocation5 + $0x8] sm:$0xff]   ;;  %v460_v13 = vld [vmem:[#allocation5 + $0x10] sm:$0xff]   ;;  %s585_s20 = smov [#allocation8]  }
  0x39   :  { %428 = vmatprep.subr.bf16.mxu1 %v583_v3  ;;  %409 = vmatpush3.bf16.msra.mxu0 %v458_v2  ;;  %v461_v14 = vld [vmem:[#allocation5 + $0x18] sm:$0xff]   ;;  %v462_v15 = vld [vmem:[#allocation5 + $0x20] sm:$0xff]   ;;  %v463_v16 = vld [vmem:[#allocation5 + $0x28] sm:$0xff]   ;;  %s357_s21 = sshll.u32 %s585_s20, 4  ;;  %s358_s21 = int_to_ptr.vmem [resolvable:$true] %s357_s21 }
  0x3a   :  { %410 = vmatprep.subr.bf16.mxu0 %v583_v3  ;;  %424 = vmatprep.mubr.msk.bf16.mxu0 %vm584_vm0, %v583_v3  ;;  %v464_v17 = vld [vmem:[#allocation5 + $0x30] sm:$0xff]   ;;  %v465_v18 = vld [vmem:[#allocation5 + $0x38] sm:$0xff]   ;;  %v466_v19 = vld [vmem:[#allocation7] sm:$0xff]   ;;  %s548_s22 = scalar_lea.vmem %s358_s21, 256  ;;  %p553_p11 = scmp.lt.s32.totalorder %s358_s21, %s358_s21 }
  0x3b   :  { %444 = vmatprep.mubr.msk.bf16.mxu1 %vm584_vm0, %v583_v3  ;;  %429 = vmatpush3.bf16.msra.mxu1 %v466_v19  ;;  %v467_v20 = vld [vmem:[#allocation7 + $0x8] sm:$0xff]   ;;  %v370_v29 = vld [vmem:[%s727_s1] ss:$0 sm:$0xff]  ;;  %v469_v39 = vld [vmem:[#allocation7 + $0x18] sm:$0xff]   ;;  %p549_p10 = scmp.ne.s32.totalorder %s358_s21, %s548_s22  ;;  %p554_p12 = scmp.lt.s32.totalorder %s548_s22, %s548_s22 }
  0x3c   :  { %73 = vadd.xlane.f32.xlu0 %v673_v1  ;;  %430 = vmatprep.subr.bf16.mxu1 %v583_v3  ;;  %v371_v33 = vld [vmem:[%s728_s2] ss:$0 sm:$0xff]  ;;  %v470_v40 = vld [vmem:[#allocation7 + $0x20] sm:$0xff]   ;;  %v471_v41 = vld [vmem:[#allocation7 + $0x28] sm:$0xff]  }
  0x3d   :  { %411 = vmatpush3.bf16.msra.mxu0 %v459_v12  ;;  %v468_v38 = vld [vmem:[#allocation7 + $0x10] sm:$0xff]   ;;  %v473_v43 = vld [vmem:[#allocation7 + $0x38] sm:$0xff]   ;;  %p555_p13 = por %p554_p12, %p553_p11 }
  0x3e   :  { %412 = vmatprep.subr.bf16.mxu0 %v583_v3  ;;  %v472_v42 = vld [vmem:[#allocation7 + $0x30] sm:$0xff]  }
  0x3f   :  { %431 = vmatpush3.bf16.msra.mxu1 %v467_v20  ;;  %v372_v44 = vld [vmem:[%s730_s4] ss:$0 sm:$0xff]  ;;  %p556_p0 = pnand %p555_p13, %p549_p10 }
  0x40   :  { %432 = vmatprep.subr.bf16.mxu1 %v583_v3  ;;  %v381_v62 = vld [vmem:[%s732_s6] ss:$0 sm:$0xff] }
  0x41   :  { %413 = vmatpush3.bf16.msra.mxu0 %v460_v13 }
  0x42   :  { %414 = vmatprep.subr.bf16.mxu0 %v583_v3 }
  0x43   :  { %433 = vmatpush3.bf16.msra.mxu1 %v468_v38 }
  0x44   :  { %434 = vmatprep.subr.bf16.mxu1 %v583_v3 }
  0x45   :  { %415 = vmatpush3.bf16.msra.mxu0 %v461_v14 }
  0x46   :  { %416 = vmatprep.subr.bf16.mxu0 %v583_v3 }
  0x47   :  { %435 = vmatpush3.bf16.msra.mxu1 %v469_v39 }
  0x48   :  { %436 = vmatprep.subr.bf16.mxu1 %v583_v3 }
  0x49   :  { %417 = vmatpush3.bf16.msra.mxu0 %v462_v15 }
  0x4a   :  { %418 = vmatprep.subr.bf16.mxu0 %v583_v3 }
  0x4b   :  { %437 = vmatpush3.bf16.msra.mxu1 %v470_v40 }
  0x4c   :  { %438 = vmatprep.subr.bf16.mxu1 %v583_v3 }
  0x4d   :  { %419 = vmatpush3.bf16.msra.mxu0 %v463_v16 }
  0x4e   :  { %420 = vmatprep.subr.bf16.mxu0 %v583_v3 }
  0x4f   :  { %439 = vmatpush3.bf16.msra.mxu1 %v471_v41 }
  0x50   :  { %440 = vmatprep.subr.bf16.mxu1 %v583_v3 }
  0x51   :  { %421 = vmatpush3.bf16.msra.mxu0 %v464_v17 }
  0x52   :  { %422 = vmatprep.subr.bf16.mxu0 %v583_v3 }
  0x53   :  { %441 = vmatpush3.bf16.msra.mxu1 %v472_v42 }
  0x54   :  { %442 = vmatprep.subr.bf16.mxu1 %v583_v3 }
  0x55   :  { %423 = vmatpush3.bf16.msra.mxu0 %v465_v18 }
  0x57   :  { %443 = vmatpush3.bf16.msra.mxu1 %v473_v43 }
  0xc5   :  { %v72_v4 = vpop.xlane.xlu0 %71 }
  0xc6   :  { %v76_v5 = vmul.f32 0.0078125, %v72_v4 }
  0xc8   :  { %v78_v6 = vsub.f32 %v671_v0, %v76_v5 }
  0xc9   :  { %v74_v7 = vpop.xlane.xlu0 %73 }
  0xca   :  { %v77_v8 = vmul.f32 0.0078125, %v74_v7  ;;  %v80_v9 = vmul.f32 %v78_v6, %v78_v6 }
  0xcc   :  { %v79_v10 = vsub.f32 %v673_v1, %v77_v8  ;;  %82 = vadd.xlane.f32.xlu1 %v80_v9 }
  0xce   :  { %v81_v11 = vmul.f32 %v79_v10, %v79_v10 }
  0xd0   :  { %84 = vadd.xlane.f32.xlu1 %v81_v11 }
 0x159   :  { %v83_v21 = vpop.xlane.xlu1 %82 }
 0x15a   :  { %v86_v22 = vmul.f32 0.0078125, %v83_v21 }
 0x15c   :  { %v88_v23 = vadd.f32 1e-05, %v86_v22 }
 0x15d   :  { %v85_v24 = vpop.xlane.xlu1 %84 }
 0x15e   :  { %474 = vrsqrt.f32 %v88_v23  ;;  %v87_v25 = vmul.f32 0.0078125, %v85_v24 }
 0x160   :  { %v89_v26 = vadd.f32 1e-05, %v87_v25 }
 0x162   :  { %476 = vrsqrt.f32 %v89_v26 }
 0x168   :  { %v475_v27 = vpop.eup %474 }
 0x169   :  { %v92_v28 = vmul.f32 %v475_v27, %v78_v6 }
 0x16b   :  { %v101_v32 = vmul.f32 %v370_v29, %v92_v28 }
 0x16c   :  { %v477_v30 = vpop.eup %476 }
 0x16d   :  { %v93_v31 = vmul.f32 %v477_v30, %v79_v10  ;;  %v110_v35 = vadd.f32 %v371_v33, %v101_v32 }
 0x16f   :  { %v102_v34 = vmul.f32 %v370_v29, %v93_v31 }
 0x171   :  { %v111_v36 = vadd.f32 %v371_v33, %v102_v34 }
 0x173   :  { %v112_v37 = vpack.c.bf16 %v111_v36, %v110_v35 }
 0x175   :  { %425 = vmatmul.mubr.bf16.vlgmr.msra.gmra.mrb[0].mxu0 %v112_v37 }
 0x248   :  { %v218_v45 = vpop.f32.mrb[0].mxu0 }
 0x249   :  { %v219_v46 = vadd.f32 %v372_v44, %v218_v45  ;;  %v426_v47 = vpop.f32.mrb[1].mxu0 }
 0x24a   :  { %v221_v48 = vpop.f32.mrb[2].mxu0 }
 0x24b   :  { %v227_v49 = vmul.f32 0.70710677, %v219_v46  ;;  %v222_v50 = vadd.f32 %v372_v44, %v221_v48  ;;  %v427_v51 = vpop.f32.mrb[3].mxu0  ;;  %v225_v56 = vmul.f32 0.5, %v219_v46 }
 0x24d   :  { %478 = verf.f32 %v227_v49  ;;  %v228_v52 = vmul.f32 0.70710677, %v222_v50  ;;  %v226_v57 = vmul.f32 0.5, %v222_v50 }
 0x24f   :  { %480 = verf.f32 %v228_v52 }
 0x257   :  { %v479_v53 = vpop.eup %478 }
 0x258   :  { %v231_v54 = vadd.f32 1.0, %v479_v53 }
 0x259   :  { %v481_v55 = vpop.eup %480 }
 0x25a   :  { %v232_v58 = vadd.f32 1.0, %v481_v55  ;;  %v233_v59 = vmul.f32 %v231_v54, %v225_v56 }
 0x25c   :  { %v234_v60 = vmul.f32 %v232_v58, %v226_v57 }
 0x25e   :  { %v235_v61 = vpack.c.bf16 %v234_v60, %v233_v59 }
 0x260   :  { %445 = vmatmul.mubr.bf16.vlgmr.msra.gmra.mrb[0].mxu1 %v235_v61 }
 0x333   :  { %v341_v63 = vpop.f32.mrb[0].mxu1 }
 0x334   :  { %v342_v2 = vadd.f32 %v381_v62, %v341_v63  ;;  %v446_v3 = vpop.f32.mrb[1].mxu1 }
 0x335   :  { %v344_v4 = vpop.f32.mrb[2].mxu1 }
 0x336   :  { %v348_v5 = vadd.f32 %v342_v2, %v671_v0  ;;  %v345_v6 = vadd.f32 %v381_v62, %v344_v4  ;;  %v447_v7 = vpop.f32.mrb[3].mxu1 }
 0x338   :  { %350 = vst [vmem:[#allocation8] sm:$0xff] %v348_v5  ;;  %v349_v8 = vadd.f32 %v345_v6, %v673_v1 }
 0x33a   :  { %351 = vst [vmem:[#allocation8 + $0x8] sm:$0xff] %v349_v8 }
 0x33b   :  { %559 = shalt.err (!%p556_p0)
}
 0x33c   :  { %s560_s24 = scalar_lea.hbm %s733_s7, 256 }
 0x33d   :  { %p561_p1 = scmp.ne.s32.totalorder %s733_s7, %s560_s24  ;;  %p564_p2 = scmp.lt.u32.totalorder %s560_s24, %s733_s7 }
 0x33f   :  { %p566_p3 = pnand %p564_p2, %p561_p1 }
 0x341   :  { %569 = shalt.err (!%p566_p3)
}
 0x342   :  { %363 = dma.vmem_to_hbm [thread:$0]  %s358_s21, 256, %s733_s7, [#allocation4], %s580_s3, %s580_s3, %s581_s25  }
 0x343   :  { %574 = dma.done.wait [#allocation4], 256  }
 0x344   :  { %575 = vsyncadd [#allocation4], 4294967040 }
 0x345   :  { %367 = vsyncpa [#allocation3], 1 }
 0x346   :  { %368 = vsyncpa [#allocation6], 1 }
 0x347   :  { %369 = vsyncpa [#allocation4], 1 }

</bundles_post_ra>
